<compile_context>
chip_gen: v7x
topology: tpu7x:2x2x1
jax: 0.10.0
libtpu: 0.0.40
codegen_flags: <defaults>
</compile_context>

<pallas_src>
import jax
import jax.numpy as jnp
from jax import lax
from jax.experimental import pallas as pl
from jax.experimental.pallas import tpu as pltpu

INPUT_SIZE = 28
HIDDEN = 64
OUT = 10

GATES = 4 * HIDDEN   # 256 lanes: [i | f | g | o], 64 lanes each (PyTorch order)
OUT_PAD = 128        # lane-dense output store
SUBLANE = 8          # f32 sublane tile


def lstm_kernel(x_ref, w_ih_ref, w_hh_ref, b_ref, w_out_ref, b_out_ref,
                out_ref, xw_ref):
    # x_ref:     (T*Bp, I)      bf16, time-major, batch padded to sublane mult.
    # w_ih_ref:  (I, 4*H)       bf16, gate cols [i|f|g|o], i/f/o pre-scaled 0.5
    # w_hh_ref:  (H, 4*H)       bf16, same layout / scaling
    # b_ref:     (1, 4*H)       f32, b_ih + b_hh, i/f/o pre-scaled 0.5
    # w_out_ref: (H, OUT_PAD)   bf16
    # b_out_ref: (1, OUT_PAD)   f32
    # out_ref:   (Bp, OUT_PAD)  f32
    # xw_ref:    (T*Bp, 4*H)    f32 scratch: hoisted input projection + bias
    tb = xw_ref.shape[0]
    bp = out_ref.shape[0]
    nt = tb // bp

    # Hoisted input projection for all timesteps: one bf16 MXU matmul with
    # f32 accumulation, bias folded in.
    xw_ref[...] = (jnp.dot(x_ref[...], w_ih_ref[...],
                           preferred_element_type=jnp.float32) + b_ref[...])

    w_hh = w_hh_ref[...]

    def step(t, carry):
        h, c = carry
        row = pl.multiple_of(t * bp, SUBLANE)
        # Serial recurrent matmul: bf16 operands, f32 accumulation, K = 64.
        gates = xw_ref[pl.ds(row, bp), :] + jnp.dot(
            h.astype(jnp.bfloat16), w_hh, preferred_element_type=jnp.float32)

        # Gate layout: [i | f | g | o], 64 lanes each.  i/f/o pre-activations
        # were pre-scaled by 0.5 in the weights, so
        #   sigmoid(z) = 0.5 * tanh(z/2) + 0.5 = 0.5 * tanh(gates_ifo) + 0.5.
        # tanh runs on packed 128-lane blocks: 3 EUP vregs/step total
        # (tanh([i|f]), tanh([g|o]), tanh(c_new)).
        t_if = jnp.tanh(gates[:, 0:2 * HIDDEN])            # [tanh(i/2)|tanh(f/2)]
        t_go = jnp.tanh(gates[:, 2 * HIDDEN:4 * HIDDEN])   # [tanh(g)  |tanh(o/2)]
        s_if = 0.5 * t_if + 0.5                            # [sig(i)   |sig(f)]
        i = s_if[:, :HIDDEN]
        f = s_if[:, HIDDEN:]
        g = t_go[:, :HIDDEN]
        o = 0.5 * t_go[:, HIDDEN:] + 0.5                   # sig(o)
        c_new = f * c + i * g
        h_new = o * jnp.tanh(c_new)
        return h_new, c_new

    h0 = jnp.zeros((bp, HIDDEN), jnp.float32)
    c0 = jnp.zeros((bp, HIDDEN), jnp.float32)
    # Fully unrolled: T is small; gives the LLO scheduler whole-recurrence
    # visibility.  (Use partial unroll, e.g. 4, if T grows to ~28+.)
    h_last, _ = lax.fori_loop(0, nt, step, (h0, c0), unroll=True)

    # Linear head on the last hidden state; lane-dense (Bp, 128) store.
    out_ref[...] = (jnp.dot(h_last.astype(jnp.bfloat16), w_out_ref[...],
                            preferred_element_type=jnp.float32)
                    + b_out_ref[...])


def _prep_gate_weights(w, dtype):
    """Scale the i/f/o gate blocks of a (..., 4*HIDDEN) array by 0.5.

    Folds the x/2 of sigmoid(x) = 0.5*tanh(x/2) + 0.5 into the parameters so
    the kernel's gate nonlinearity is a single tanh + FMA per packed block.
    Gate order along the last axis (PyTorch): i, f, g, o.
    """
    scale = jnp.concatenate([
        jnp.full((HIDDEN,), 0.5, jnp.float32),   # i (sigmoid)
        jnp.full((HIDDEN,), 0.5, jnp.float32),   # f (sigmoid)
        jnp.ones((HIDDEN,), jnp.float32),        # g (tanh)
        jnp.full((HIDDEN,), 0.5, jnp.float32),   # o (sigmoid)
    ])
    return (w * scale).astype(dtype)


def rnn_forward(x, w_ih_t, w_hh_t, b, w_out_t, b_out):
    """x: (B, T, INPUT_SIZE) float32 -> (B, OUT) float32."""
    B, T, _ = x.shape
    b_pad = max(SUBLANE, ((B + SUBLANE - 1) // SUBLANE) * SUBLANE)

    # Fold the sigmoid pre-scale into the parameters and cast the matmul
    # operands to bf16 (f32 accumulation happens on the MXU).
    w_ih_p = _prep_gate_weights(w_ih_t, jnp.bfloat16)          # (I, 4H)
    w_hh_p = _prep_gate_weights(w_hh_t, jnp.bfloat16)          # (H, 4H)
    b_p = _prep_gate_weights(b, jnp.float32)                   # (1, 4H)
    w_out_p = jnp.zeros((HIDDEN, OUT_PAD), jnp.bfloat16)
    w_out_p = w_out_p.at[:, :OUT].set(w_out_t.astype(jnp.bfloat16))
    b_out_p = jnp.zeros((1, OUT_PAD), jnp.float32).at[:, :OUT].set(b_out)

    # Time-major, batch padded to a sublane multiple, flattened so the input
    # projection is a single batched matmul inside the kernel.
    x_tm = jnp.transpose(x, (1, 0, 2))                         # (T, B, I)
    x_tm = jnp.pad(x_tm, ((0, 0), (0, b_pad - B), (0, 0)))     # (T, Bp, I)
    x2d = x_tm.reshape(T * b_pad, INPUT_SIZE).astype(jnp.bfloat16)

    out = pl.pallas_call(
        lstm_kernel,
        out_shape=jax.ShapeDtypeStruct((b_pad, OUT_PAD), jnp.float32),
        in_specs=[pl.BlockSpec(memory_space=pltpu.MemorySpace.VMEM)] * 6,
        out_specs=pl.BlockSpec(memory_space=pltpu.MemorySpace.VMEM),
        scratch_shapes=[pltpu.VMEM((T * b_pad, GATES), jnp.float32)],
    )(x2d, w_ih_p, w_hh_p, b_p, w_out_p, b_out_p)

    return out[:B, :OUT]


def lstm_reference(x, w_ih_t, w_hh_t, b, w_out_t, b_out):
    """Pure-JAX f32 reference matching PyTorch nn.LSTM + nn.Linear semantics."""
    B, T, _ = x.shape
    h = jnp.zeros((B, HIDDEN), jnp.float32)
    c = jnp.zeros((B, HIDDEN), jnp.float32)
    for t in range(T):
        gates = x[:, t, :] @ w_ih_t + h @ w_hh_t + b
        i = jax.nn.sigmoid(gates[:, 0 * HIDDEN:1 * HIDDEN])
        f = jax.nn.sigmoid(gates[:, 1 * HIDDEN:2 * HIDDEN])
        g = jnp.tanh(gates[:, 2 * HIDDEN:3 * HIDDEN])
        o = jax.nn.sigmoid(gates[:, 3 * HIDDEN:4 * HIDDEN])
        c = f * c + i * g
        h = o * jnp.tanh(c)
    return h @ w_out_t + b_out


if __name__ == "__main__":
    key = jax.random.PRNGKey(0)
    B, T = 2, 8

    # Deterministic parameter init, matching PyTorch's U(-1/sqrt(H), 1/sqrt(H)).
    k_lstm = 1.0 / jnp.sqrt(jnp.float32(HIDDEN))
    k_lin = 1.0 / jnp.sqrt(jnp.float32(HIDDEN))
    keys = jax.random.split(key, 8)

    weight_ih = jax.random.uniform(keys[0], (4 * HIDDEN, INPUT_SIZE),
                                   jnp.float32, -k_lstm, k_lstm)
    weight_hh = jax.random.uniform(keys[1], (4 * HIDDEN, HIDDEN),
                                   jnp.float32, -k_lstm, k_lstm)
    bias_ih = jax.random.uniform(keys[2], (4 * HIDDEN,), jnp.float32,
                                 -k_lstm, k_lstm)
    bias_hh = jax.random.uniform(keys[3], (4 * HIDDEN,), jnp.float32,
                                 -k_lstm, k_lstm)
    weight_out = jax.random.uniform(keys[4], (OUT, HIDDEN), jnp.float32,
                                    -k_lin, k_lin)
    bias_out = jax.random.uniform(keys[5], (OUT,), jnp.float32, -k_lin, k_lin)

    # Pre-transpose / pre-sum for the kernel (unscaled; scaling + bf16 cast
    # happens inside rnn_forward).
    w_ih_t = weight_ih.T                            # (I, 4H)
    w_hh_t = weight_hh.T                            # (H, 4H)
    b = (bias_ih + bias_hh).reshape(1, 4 * HIDDEN)  # (1, 4H)
    w_out_t = weight_out.T                          # (H, OUT)
    b_out = bias_out.reshape(1, OUT)                # (1, OUT)

    x = jax.random.normal(keys[6], (B, T, INPUT_SIZE), jnp.float32)

    out = rnn_forward(x, w_ih_t, w_hh_t, b, w_out_t, b_out)
    out = jax.block_until_ready(out)

    ref = lstm_reference(x, w_ih_t, w_hh_t, b, w_out_t, b_out)
    assert out.shape == (B, OUT)
    # Tolerance relaxed vs f32-only version: MXU operands are bf16 now.
    assert jnp.allclose(out, ref, atol=2e-2, rtol=2e-2), (
        f"max abs err = {jnp.max(jnp.abs(out - ref))}")

    print("KERNEL_OK")
</pallas_src>

<mosaic_0001>
module attributes {stable_mosaic.version = 11 : i64} {
  func.func @lstm_kernel(%arg0: memref<64x28xbf16, #tpu.memory_space<vmem>>, %arg1: memref<28x256xbf16, #tpu.memory_space<vmem>>, %arg2: memref<64x256xbf16, #tpu.memory_space<vmem>>, %arg3: memref<1x256xf32, #tpu.memory_space<vmem>>, %arg4: memref<64x128xbf16, #tpu.memory_space<vmem>>, %arg5: memref<1x128xf32, #tpu.memory_space<vmem>>, %arg6: memref<8x128xf32, #tpu.memory_space<vmem>>, %arg7: memref<64x256xf32, #tpu.memory_space<vmem>>) attributes {dimension_semantics = [], scalar_prefetch = 0 : i64, scratch_operands = 1 : i64, tpu.core_type = #tpu.core_type<tc>} {
    %c0 = arith.constant 0 : index
    %c0_0 = arith.constant 0 : index
    %0 = vector.load %arg0[%c0, %c0_0] : memref<64x28xbf16, #tpu.memory_space<vmem>>, vector<64x28xbf16>
    %c0_1 = arith.constant 0 : index
    %c0_2 = arith.constant 0 : index
    %1 = vector.load %arg1[%c0_1, %c0_2] : memref<28x256xbf16, #tpu.memory_space<vmem>>, vector<28x256xbf16>
    %cst = arith.constant dense<0.000000e+00> : vector<64x256xf32>
    %2 = tpu.matmul %0, %1, %cst {dimension_numbers = #tpu.dot_dimension_numbers<[1], [0], [0], [1], [0, 0, 1, 1], [], []>} : vector<64x28xbf16>, vector<28x256xbf16>, vector<64x256xf32> -> vector<64x256xf32>
    %c0_3 = arith.constant 0 : index
    %c0_4 = arith.constant 0 : index
    %3 = vector.load %arg3[%c0_3, %c0_4] : memref<1x256xf32, #tpu.memory_space<vmem>>, vector<1x256xf32>
    %4 = vector.broadcast %3 : vector<1x256xf32> to vector<64x256xf32>
    %5 = arith.addf %2, %4 : vector<64x256xf32>
    %c0_5 = arith.constant 0 : index
    %c0_6 = arith.constant 0 : index
    %6 = vector.load %arg7[%c0_5, %c0_6] : memref<64x256xf32, #tpu.memory_space<vmem>>, vector<64x256xf32>
    tpu.vector_store %arg7[%c0_5, %c0_6], %5 {strides = array<i32>} : memref<64x256xf32, #tpu.memory_space<vmem>>, vector<64x256xf32>,
    %c0_7 = arith.constant 0 : index
    %c0_8 = arith.constant 0 : index
    %7 = vector.load %arg2[%c0_7, %c0_8] : memref<64x256xbf16, #tpu.memory_space<vmem>>, vector<64x256xbf16>
    %cst_9 = arith.constant 0.000000e+00 : f32
    %8 = vector.broadcast %cst_9 : f32 to vector<8x64xf32>
    %cst_10 = arith.constant 0.000000e+00 : f32
    %9 = vector.broadcast %cst_10 : f32 to vector<8x64xf32>
    %c0_i32 = arith.constant 0 : i32
    %c8_i32 = arith.constant 8 : i32
    %10 = arith.muli %c0_i32, %c8_i32 : i32
    %11 = tpu.assume_multiple %10, 8 : i32
    %12 = arith.index_cast %11 : i32 to index
    %c0_11 = arith.constant 0 : index
    %13 = vector.load %arg7[%12, %c0_11] : memref<64x256xf32, #tpu.memory_space<vmem>>, vector<8x256xf32>
    %14 = arith.truncf %8 : vector<8x64xf32> to vector<8x64xbf16>
    %cst_12 = arith.constant dense<0.000000e+00> : vector<8x256xf32>
    %15 = tpu.matmul %14, %7, %cst_12 {dimension_numbers = #tpu.dot_dimension_numbers<[1], [0], [0], [1], [0, 0, 1, 1], [], []>} : vector<8x64xbf16>, vector<64x256xbf16>, vector<8x256xf32> -> vector<8x256xf32>
    %16 = arith.addf %13, %15 : vector<8x256xf32>
    %17 = vector.extract_strided_slice %16 {offsets = [0, 0], sizes = [8, 128], strides = [1, 1]} : vector<8x256xf32> to vector<8x128xf32>
    %18 = math.tanh %17 : vector<8x128xf32>
    %19 = vector.extract_strided_slice %16 {offsets = [0, 128], sizes = [8, 128], strides = [1, 1]} : vector<8x256xf32> to vector<8x128xf32>
    %20 = math.tanh %19 : vector<8x128xf32>
    %cst_13 = arith.constant 5.000000e-01 : f32
    %21 = vector.broadcast %cst_13 : f32 to vector<8x128xf32>
    %22 = arith.mulf %21, %18 : vector<8x128xf32>
    %cst_14 = arith.constant 5.000000e-01 : f32
    %23 = vector.broadcast %cst_14 : f32 to vector<8x128xf32>
    %24 = arith.addf %22, %23 : vector<8x128xf32>
    %25 = vector.extract_strided_slice %24 {offsets = [0, 0], sizes = [8, 64], strides = [1, 1]} : vector<8x128xf32> to vector<8x64xf32>
    %26 = vector.extract_strided_slice %24 {offsets = [0, 64], sizes = [8, 64], strides = [1, 1]} : vector<8x128xf32> to vector<8x64xf32>
    %27 = vector.extract_strided_slice %20 {offsets = [0, 0], sizes = [8, 64], strides = [1, 1]} : vector<8x128xf32> to vector<8x64xf32>
    %28 = vector.extract_strided_slice %20 {offsets = [0, 64], sizes = [8, 64], strides = [1, 1]} : vector<8x128xf32> to vector<8x64xf32>
    %cst_15 = arith.constant 5.000000e-01 : f32
    %29 = vector.broadcast %cst_15 : f32 to vector<8x64xf32>
    %30 = arith.mulf %29, %28 : vector<8x64xf32>
    %cst_16 = arith.constant 5.000000e-01 : f32
    %31 = vector.broadcast %cst_16 : f32 to vector<8x64xf32>
    %32 = arith.addf %30, %31 : vector<8x64xf32>
    %33 = arith.mulf %26, %9 : vector<8x64xf32>
    %34 = arith.mulf %25, %27 : vector<8x64xf32>
    %35 = arith.addf %33, %34 : vector<8x64xf32>
    %36 = math.tanh %35 : vector<8x64xf32>
    %37 = arith.mulf %32, %36 : vector<8x64xf32>
    %c1_i32 = arith.constant 1 : i32
    %c8_i32_17 = arith.constant 8 : i32
    %38 = arith.muli %c1_i32, %c8_i32_17 : i32
    %39 = tpu.assume_multiple %38, 8 : i32
    %40 = arith.index_cast %39 : i32 to index
    %c0_18 = arith.constant 0 : index
    %41 = vector.load %arg7[%40, %c0_18] : memref<64x256xf32, #tpu.memory_space<vmem>>, vector<8x256xf32>
    %42 = arith.truncf %37 : vector<8x64xf32> to vector<8x64xbf16>
    %cst_19 = arith.constant dense<0.000000e+00> : vector<8x256xf32>
    %43 = tpu.matmul %42, %7, %cst_19 {dimension_numbers = #tpu.dot_dimension_numbers<[1], [0], [0], [1], [0, 0, 1, 1], [], []>} : vector<8x64xbf16>, vector<64x256xbf16>, vector<8x256xf32> -> vector<8x256xf32>
    %44 = arith.addf %41, %43 : vector<8x256xf32>
    %45 = vector.extract_strided_slice %44 {offsets = [0, 0], sizes = [8, 128], strides = [1, 1]} : vector<8x256xf32> to vector<8x128xf32>
    %46 = math.tanh %45 : vector<8x128xf32>
    %47 = vector.extract_strided_slice %44 {offsets = [0, 128], sizes = [8, 128], strides = [1, 1]} : vector<8x256xf32> to vector<8x128xf32>
    %48 = math.tanh %47 : vector<8x128xf32>
    %cst_20 = arith.constant 5.000000e-01 : f32
    %49 = vector.broadcast %cst_20 : f32 to vector<8x128xf32>
    %50 = arith.mulf %49, %46 : vector<8x128xf32>
    %cst_21 = arith.constant 5.000000e-01 : f32
    %51 = vector.broadcast %cst_21 : f32 to vector<8x128xf32>
    %52 = arith.addf %50, %51 : vector<8x128xf32>
    %53 = vector.extract_strided_slice %52 {offsets = [0, 0], sizes = [8, 64], strides = [1, 1]} : vector<8x128xf32> to vector<8x64xf32>
    %54 = vector.extract_strided_slice %52 {offsets = [0, 64], sizes = [8, 64], strides = [1, 1]} : vector<8x128xf32> to vector<8x64xf32>
    %55 = vector.extract_strided_slice %48 {offsets = [0, 0], sizes = [8, 64], strides = [1, 1]} : vector<8x128xf32> to vector<8x64xf32>
    %56 = vector.extract_strided_slice %48 {offsets = [0, 64], sizes = [8, 64], strides = [1, 1]} : vector<8x128xf32> to vector<8x64xf32>
    %cst_22 = arith.constant 5.000000e-01 : f32
    %57 = vector.broadcast %cst_22 : f32 to vector<8x64xf32>
    %58 = arith.mulf %57, %56 : vector<8x64xf32>
    %cst_23 = arith.constant 5.000000e-01 : f32
    %59 = vector.broadcast %cst_23 : f32 to vector<8x64xf32>
    %60 = arith.addf %58, %59 : vector<8x64xf32>
    %61 = arith.mulf %54, %35 : vector<8x64xf32>
    %62 = arith.mulf %53, %55 : vector<8x64xf32>
    %63 = arith.addf %61, %62 : vector<8x64xf32>
    %64 = math.tanh %63 : vector<8x64xf32>
    %65 = arith.mulf %60, %64 : vector<8x64xf32>
    %c2_i32 = arith.constant 2 : i32
    %c8_i32_24 = arith.constant 8 : i32
    %66 = arith.muli %c2_i32, %c8_i32_24 : i32
    %67 = tpu.assume_multiple %66, 8 : i32
    %68 = arith.index_cast %67 : i32 to index
    %c0_25 = arith.constant 0 : index
    %69 = vector.load %arg7[%68, %c0_25] : memref<64x256xf32, #tpu.memory_space<vmem>>, vector<8x256xf32>
    %70 = arith.truncf %65 : vector<8x64xf32> to vector<8x64xbf16>
    %cst_26 = arith.constant dense<0.000000e+00> : vector<8x256xf32>
    %71 = tpu.matmul %70, %7, %cst_26 {dimension_numbers = #tpu.dot_dimension_numbers<[1], [0], [0], [1], [0, 0, 1, 1], [], []>} : vector<8x64xbf16>, vector<64x256xbf16>, vector<8x256xf32> -> vector<8x256xf32>
    %72 = arith.addf %69, %71 : vector<8x256xf32>
    %73 = vector.extract_strided_slice %72 {offsets = [0, 0], sizes = [8, 128], strides = [1, 1]} : vector<8x256xf32> to vector<8x128xf32>
    %74 = math.tanh %73 : vector<8x128xf32>
    %75 = vector.extract_strided_slice %72 {offsets = [0, 128], sizes = [8, 128], strides = [1, 1]} : vector<8x256xf32> to vector<8x128xf32>
    %76 = math.tanh %75 : vector<8x128xf32>
    %cst_27 = arith.constant 5.000000e-01 : f32
    %77 = vector.broadcast %cst_27 : f32 to vector<8x128xf32>
    %78 = arith.mulf %77, %74 : vector<8x128xf32>
    %cst_28 = arith.constant 5.000000e-01 : f32
    %79 = vector.broadcast %cst_28 : f32 to vector<8x128xf32>
    %80 = arith.addf %78, %79 : vector<8x128xf32>
    %81 = vector.extract_strided_slice %80 {offsets = [0, 0], sizes = [8, 64], strides = [1, 1]} : vector<8x128xf32> to vector<8x64xf32>
    %82 = vector.extract_strided_slice %80 {offsets = [0, 64], sizes = [8, 64], strides = [1, 1]} : vector<8x128xf32> to vector<8x64xf32>
    %83 = vector.extract_strided_slice %76 {offsets = [0, 0], sizes = [8, 64], strides = [1, 1]} : vector<8x128xf32> to vector<8x64xf32>
    %84 = vector.extract_strided_slice %76 {offsets = [0, 64], sizes = [8, 64], strides = [1, 1]} : vector<8x128xf32> to vector<8x64xf32>
    %cst_29 = arith.constant 5.000000e-01 : f32
    %85 = vector.broadcast %cst_29 : f32 to vector<8x64xf32>
    %86 = arith.mulf %85, %84 : vector<8x64xf32>
    %cst_30 = arith.constant 5.000000e-01 : f32
    %87 = vector.broadcast %cst_30 : f32 to vector<8x64xf32>
    %88 = arith.addf %86, %87 : vector<8x64xf32>
    %89 = arith.mulf %82, %63 : vector<8x64xf32>
    %90 = arith.mulf %81, %83 : vector<8x64xf32>
    %91 = arith.addf %89, %90 : vector<8x64xf32>
    %92 = math.tanh %91 : vector<8x64xf32>
    %93 = arith.mulf %88, %92 : vector<8x64xf32>
    %c3_i32 = arith.constant 3 : i32
    %c8_i32_31 = arith.constant 8 : i32
    %94 = arith.muli %c3_i32, %c8_i32_31 : i32
    %95 = tpu.assume_multiple %94, 8 : i32
    %96 = arith.index_cast %95 : i32 to index
    %c0_32 = arith.constant 0 : index
    %97 = vector.load %arg7[%96, %c0_32] : memref<64x256xf32, #tpu.memory_space<vmem>>, vector<8x256xf32>
    %98 = arith.truncf %93 : vector<8x64xf32> to vector<8x64xbf16>
    %cst_33 = arith.constant dense<0.000000e+00> : vector<8x256xf32>
    %99 = tpu.matmul %98, %7, %cst_33 {dimension_numbers = #tpu.dot_dimension_numbers<[1], [0], [0], [1], [0, 0, 1, 1], [], []>} : vector<8x64xbf16>, vector<64x256xbf16>, vector<8x256xf32> -> vector<8x256xf32>
    %100 = arith.addf %97, %99 : vector<8x256xf32>
    %101 = vector.extract_strided_slice %100 {offsets = [0, 0], sizes = [8, 128], strides = [1, 1]} : vector<8x256xf32> to vector<8x128xf32>
    %102 = math.tanh %101 : vector<8x128xf32>
    %103 = vector.extract_strided_slice %100 {offsets = [0, 128], sizes = [8, 128], strides = [1, 1]} : vector<8x256xf32> to vector<8x128xf32>
    %104 = math.tanh %103 : vector<8x128xf32>
    %cst_34 = arith.constant 5.000000e-01 : f32
    %105 = vector.broadcast %cst_34 : f32 to vector<8x128xf32>
    %106 = arith.mulf %105, %102 : vector<8x128xf32>
    %cst_35 = arith.constant 5.000000e-01 : f32
    %107 = vector.broadcast %cst_35 : f32 to vector<8x128xf32>
    %108 = arith.addf %106, %107 : vector<8x128xf32>
    %109 = vector.extract_strided_slice %108 {offsets = [0, 0], sizes = [8, 64], strides = [1, 1]} : vector<8x128xf32> to vector<8x64xf32>
    %110 = vector.extract_strided_slice %108 {offsets = [0, 64], sizes = [8, 64], strides = [1, 1]} : vector<8x128xf32> to vector<8x64xf32>
    %111 = vector.extract_strided_slice %104 {offsets = [0, 0], sizes = [8, 64], strides = [1, 1]} : vector<8x128xf32> to vector<8x64xf32>
    %112 = vector.extract_strided_slice %104 {offsets = [0, 64], sizes = [8, 64], strides = [1, 1]} : vector<8x128xf32> to vector<8x64xf32>
    %cst_36 = arith.constant 5.000000e-01 : f32
    %113 = vector.broadcast %cst_36 : f32 to vector<8x64xf32>
    %114 = arith.mulf %113, %112 : vector<8x64xf32>
    %cst_37 = arith.constant 5.000000e-01 : f32
    %115 = vector.broadcast %cst_37 : f32 to vector<8x64xf32>
    %116 = arith.addf %114, %115 : vector<8x64xf32>
    %117 = arith.mulf %110, %91 : vector<8x64xf32>
    %118 = arith.mulf %109, %111 : vector<8x64xf32>
    %119 = arith.addf %117, %118 : vector<8x64xf32>
    %120 = math.tanh %119 : vector<8x64xf32>
    %121 = arith.mulf %116, %120 : vector<8x64xf32>
    %c4_i32 = arith.constant 4 : i32
    %c8_i32_38 = arith.constant 8 : i32
    %122 = arith.muli %c4_i32, %c8_i32_38 : i32
    %123 = tpu.assume_multiple %122, 8 : i32
    %124 = arith.index_cast %123 : i32 to index
    %c0_39 = arith.constant 0 : index
    %125 = vector.load %arg7[%124, %c0_39] : memref<64x256xf32, #tpu.memory_space<vmem>>, vector<8x256xf32>
    %126 = arith.truncf %121 : vector<8x64xf32> to vector<8x64xbf16>
    %cst_40 = arith.constant dense<0.000000e+00> : vector<8x256xf32>
    %127 = tpu.matmul %126, %7, %cst_40 {dimension_numbers = #tpu.dot_dimension_numbers<[1], [0], [0], [1], [0, 0, 1, 1], [], []>} : vector<8x64xbf16>, vector<64x256xbf16>, vector<8x256xf32> -> vector<8x256xf32>
    %128 = arith.addf %125, %127 : vector<8x256xf32>
    %129 = vector.extract_strided_slice %128 {offsets = [0, 0], sizes = [8, 128], strides = [1, 1]} : vector<8x256xf32> to vector<8x128xf32>
    %130 = math.tanh %129 : vector<8x128xf32>
    %131 = vector.extract_strided_slice %128 {offsets = [0, 128], sizes = [8, 128], strides = [1, 1]} : vector<8x256xf32> to vector<8x128xf32>
    %132 = math.tanh %131 : vector<8x128xf32>
    %cst_41 = arith.constant 5.000000e-01 : f32
    %133 = vector.broadcast %cst_41 : f32 to vector<8x128xf32>
    %134 = arith.mulf %133, %130 : vector<8x128xf32>
    %cst_42 = arith.constant 5.000000e-01 : f32
    %135 = vector.broadcast %cst_42 : f32 to vector<8x128xf32>
    %136 = arith.addf %134, %135 : vector<8x128xf32>
    %137 = vector.extract_strided_slice %136 {offsets = [0, 0], sizes = [8, 64], strides = [1, 1]} : vector<8x128xf32> to vector<8x64xf32>
    %138 = vector.extract_strided_slice %136 {offsets = [0, 64], sizes = [8, 64], strides = [1, 1]} : vector<8x128xf32> to vector<8x64xf32>
    %139 = vector.extract_strided_slice %132 {offsets = [0, 0], sizes = [8, 64], strides = [1, 1]} : vector<8x128xf32> to vector<8x64xf32>
    %140 = vector.extract_strided_slice %132 {offsets = [0, 64], sizes = [8, 64], strides = [1, 1]} : vector<8x128xf32> to vector<8x64xf32>
    %cst_43 = arith.constant 5.000000e-01 : f32
    %141 = vector.broadcast %cst_43 : f32 to vector<8x64xf32>
    %142 = arith.mulf %141, %140 : vector<8x64xf32>
    %cst_44 = arith.constant 5.000000e-01 : f32
    %143 = vector.broadcast %cst_44 : f32 to vector<8x64xf32>
    %144 = arith.addf %142, %143 : vector<8x64xf32>
    %145 = arith.mulf %138, %119 : vector<8x64xf32>
    %146 = arith.mulf %137, %139 : vector<8x64xf32>
    %147 = arith.addf %145, %146 : vector<8x64xf32>
    %148 = math.tanh %147 : vector<8x64xf32>
    %149 = arith.mulf %144, %148 : vector<8x64xf32>
    %c5_i32 = arith.constant 5 : i32
    %c8_i32_45 = arith.constant 8 : i32
    %150 = arith.muli %c5_i32, %c8_i32_45 : i32
    %151 = tpu.assume_multiple %150, 8 : i32
    %152 = arith.index_cast %151 : i32 to index
    %c0_46 = arith.constant 0 : index
    %153 = vector.load %arg7[%152, %c0_46] : memref<64x256xf32, #tpu.memory_space<vmem>>, vector<8x256xf32>
    %154 = arith.truncf %149 : vector<8x64xf32> to vector<8x64xbf16>
    %cst_47 = arith.constant dense<0.000000e+00> : vector<8x256xf32>
    %155 = tpu.matmul %154, %7, %cst_47 {dimension_numbers = #tpu.dot_dimension_numbers<[1], [0], [0], [1], [0, 0, 1, 1], [], []>} : vector<8x64xbf16>, vector<64x256xbf16>, vector<8x256xf32> -> vector<8x256xf32>
    %156 = arith.addf %153, %155 : vector<8x256xf32>
    %157 = vector.extract_strided_slice %156 {offsets = [0, 0], sizes = [8, 128], strides = [1, 1]} : vector<8x256xf32> to vector<8x128xf32>
    %158 = math.tanh %157 : vector<8x128xf32>
    %159 = vector.extract_strided_slice %156 {offsets = [0, 128], sizes = [8, 128], strides = [1, 1]} : vector<8x256xf32> to vector<8x128xf32>
    %160 = math.tanh %159 : vector<8x128xf32>
    %cst_48 = arith.constant 5.000000e-01 : f32
    %161 = vector.broadcast %cst_48 : f32 to vector<8x128xf32>
    %162 = arith.mulf %161, %158 : vector<8x128xf32>
    %cst_49 = arith.constant 5.000000e-01 : f32
    %163 = vector.broadcast %cst_49 : f32 to vector<8x128xf32>
    %164 = arith.addf %162, %163 : vector<8x128xf32>
    %165 = vector.extract_strided_slice %164 {offsets = [0, 0], sizes = [8, 64], strides = [1, 1]} : vector<8x128xf32> to vector<8x64xf32>
    %166 = vector.extract_strided_slice %164 {offsets = [0, 64], sizes = [8, 64], strides = [1, 1]} : vector<8x128xf32> to vector<8x64xf32>
    %167 = vector.extract_strided_slice %160 {offsets = [0, 0], sizes = [8, 64], strides = [1, 1]} : vector<8x128xf32> to vector<8x64xf32>
    %168 = vector.extract_strided_slice %160 {offsets = [0, 64], sizes = [8, 64], strides = [1, 1]} : vector<8x128xf32> to vector<8x64xf32>
    %cst_50 = arith.constant 5.000000e-01 : f32
    %169 = vector.broadcast %cst_50 : f32 to vector<8x64xf32>
    %170 = arith.mulf %169, %168 : vector<8x64xf32>
    %cst_51 = arith.constant 5.000000e-01 : f32
    %171 = vector.broadcast %cst_51 : f32 to vector<8x64xf32>
    %172 = arith.addf %170, %171 : vector<8x64xf32>
    %173 = arith.mulf %166, %147 : vector<8x64xf32>
    %174 = arith.mulf %165, %167 : vector<8x64xf32>
    %175 = arith.addf %173, %174 : vector<8x64xf32>
    %176 = math.tanh %175 : vector<8x64xf32>
    %177 = arith.mulf %172, %176 : vector<8x64xf32>
    %c6_i32 = arith.constant 6 : i32
    %c8_i32_52 = arith.constant 8 : i32
    %178 = arith.muli %c6_i32, %c8_i32_52 : i32
    %179 = tpu.assume_multiple %178, 8 : i32
    %180 = arith.index_cast %179 : i32 to index
    %c0_53 = arith.constant 0 : index
    %181 = vector.load %arg7[%180, %c0_53] : memref<64x256xf32, #tpu.memory_space<vmem>>, vector<8x256xf32>
    %182 = arith.truncf %177 : vector<8x64xf32> to vector<8x64xbf16>
    %cst_54 = arith.constant dense<0.000000e+00> : vector<8x256xf32>
    %183 = tpu.matmul %182, %7, %cst_54 {dimension_numbers = #tpu.dot_dimension_numbers<[1], [0], [0], [1], [0, 0, 1, 1], [], []>} : vector<8x64xbf16>, vector<64x256xbf16>, vector<8x256xf32> -> vector<8x256xf32>
    %184 = arith.addf %181, %183 : vector<8x256xf32>
    %185 = vector.extract_strided_slice %184 {offsets = [0, 0], sizes = [8, 128], strides = [1, 1]} : vector<8x256xf32> to vector<8x128xf32>
    %186 = math.tanh %185 : vector<8x128xf32>
    %187 = vector.extract_strided_slice %184 {offsets = [0, 128], sizes = [8, 128], strides = [1, 1]} : vector<8x256xf32> to vector<8x128xf32>
    %188 = math.tanh %187 : vector<8x128xf32>
    %cst_55 = arith.constant 5.000000e-01 : f32
    %189 = vector.broadcast %cst_55 : f32 to vector<8x128xf32>
    %190 = arith.mulf %189, %186 : vector<8x128xf32>
    %cst_56 = arith.constant 5.000000e-01 : f32
    %191 = vector.broadcast %cst_56 : f32 to vector<8x128xf32>
    %192 = arith.addf %190, %191 : vector<8x128xf32>
    %193 = vector.extract_strided_slice %192 {offsets = [0, 0], sizes = [8, 64], strides = [1, 1]} : vector<8x128xf32> to vector<8x64xf32>
    %194 = vector.extract_strided_slice %192 {offsets = [0, 64], sizes = [8, 64], strides = [1, 1]} : vector<8x128xf32> to vector<8x64xf32>
    %195 = vector.extract_strided_slice %188 {offsets = [0, 0], sizes = [8, 64], strides = [1, 1]} : vector<8x128xf32> to vector<8x64xf32>
    %196 = vector.extract_strided_slice %188 {offsets = [0, 64], sizes = [8, 64], strides = [1, 1]} : vector<8x128xf32> to vector<8x64xf32>
    %cst_57 = arith.constant 5.000000e-01 : f32
    %197 = vector.broadcast %cst_57 : f32 to vector<8x64xf32>
    %198 = arith.mulf %197, %196 : vector<8x64xf32>
    %cst_58 = arith.constant 5.000000e-01 : f32
    %199 = vector.broadcast %cst_58 : f32 to vector<8x64xf32>
    %200 = arith.addf %198, %199 : vector<8x64xf32>
    %201 = arith.mulf %194, %175 : vector<8x64xf32>
    %202 = arith.mulf %193, %195 : vector<8x64xf32>
    %203 = arith.addf %201, %202 : vector<8x64xf32>
    %204 = math.tanh %203 : vector<8x64xf32>
    %205 = arith.mulf %200, %204 : vector<8x64xf32>
    %c7_i32 = arith.constant 7 : i32
    %c8_i32_59 = arith.constant 8 : i32
    %206 = arith.muli %c7_i32, %c8_i32_59 : i32
    %207 = tpu.assume_multiple %206, 8 : i32
    %208 = arith.index_cast %207 : i32 to index
    %c0_60 = arith.constant 0 : index
    %209 = vector.load %arg7[%208, %c0_60] : memref<64x256xf32, #tpu.memory_space<vmem>>, vector<8x256xf32>
    %210 = arith.truncf %205 : vector<8x64xf32> to vector<8x64xbf16>
    %cst_61 = arith.constant dense<0.000000e+00> : vector<8x256xf32>
    %211 = tpu.matmul %210, %7, %cst_61 {dimension_numbers = #tpu.dot_dimension_numbers<[1], [0], [0], [1], [0, 0, 1, 1], [], []>} : vector<8x64xbf16>, vector<64x256xbf16>, vector<8x256xf32> -> vector<8x256xf32>
    %212 = arith.addf %209, %211 : vector<8x256xf32>
    %213 = vector.extract_strided_slice %212 {offsets = [0, 0], sizes = [8, 128], strides = [1, 1]} : vector<8x256xf32> to vector<8x128xf32>
    %214 = math.tanh %213 : vector<8x128xf32>
    %215 = vector.extract_strided_slice %212 {offsets = [0, 128], sizes = [8, 128], strides = [1, 1]} : vector<8x256xf32> to vector<8x128xf32>
    %216 = math.tanh %215 : vector<8x128xf32>
    %cst_62 = arith.constant 5.000000e-01 : f32
    %217 = vector.broadcast %cst_62 : f32 to vector<8x128xf32>
    %218 = arith.mulf %217, %214 : vector<8x128xf32>
    %cst_63 = arith.constant 5.000000e-01 : f32
    %219 = vector.broadcast %cst_63 : f32 to vector<8x128xf32>
    %220 = arith.addf %218, %219 : vector<8x128xf32>
    %221 = vector.extract_strided_slice %220 {offsets = [0, 0], sizes = [8, 64], strides = [1, 1]} : vector<8x128xf32> to vector<8x64xf32>
    %222 = vector.extract_strided_slice %220 {offsets = [0, 64], sizes = [8, 64], strides = [1, 1]} : vector<8x128xf32> to vector<8x64xf32>
    %223 = vector.extract_strided_slice %216 {offsets = [0, 0], sizes = [8, 64], strides = [1, 1]} : vector<8x128xf32> to vector<8x64xf32>
    %224 = vector.extract_strided_slice %216 {offsets = [0, 64], sizes = [8, 64], strides = [1, 1]} : vector<8x128xf32> to vector<8x64xf32>
    %cst_64 = arith.constant 5.000000e-01 : f32
    %225 = vector.broadcast %cst_64 : f32 to vector<8x64xf32>
    %226 = arith.mulf %225, %224 : vector<8x64xf32>
    %cst_65 = arith.constant 5.000000e-01 : f32
    %227 = vector.broadcast %cst_65 : f32 to vector<8x64xf32>
    %228 = arith.addf %226, %227 : vector<8x64xf32>
    %229 = arith.mulf %222, %203 : vector<8x64xf32>
    %230 = arith.mulf %221, %223 : vector<8x64xf32>
    %231 = arith.addf %229, %230 : vector<8x64xf32>
    %232 = math.tanh %231 : vector<8x64xf32>
    %233 = arith.mulf %228, %232 : vector<8x64xf32>
    %c8_i32_66 = arith.constant 8 : i32
    %234 = arith.truncf %233 : vector<8x64xf32> to vector<8x64xbf16>
    %c0_67 = arith.constant 0 : index
    %c0_68 = arith.constant 0 : index
    %235 = vector.load %arg4[%c0_67, %c0_68] : memref<64x128xbf16, #tpu.memory_space<vmem>>, vector<64x128xbf16>
    %cst_69 = arith.constant dense<0.000000e+00> : vector<8x128xf32>
    %236 = tpu.matmul %234, %235, %cst_69 {dimension_numbers = #tpu.dot_dimension_numbers<[1], [0], [0], [1], [0, 0, 1, 1], [], []>} : vector<8x64xbf16>, vector<64x128xbf16>, vector<8x128xf32> -> vector<8x128xf32>
    %c0_70 = arith.constant 0 : index
    %c0_71 = arith.constant 0 : index
    %237 = vector.load %arg5[%c0_70, %c0_71] : memref<1x128xf32, #tpu.memory_space<vmem>>, vector<1x128xf32>
    %238 = vector.broadcast %237 : vector<1x128xf32> to vector<8x128xf32>
    %239 = arith.addf %236, %238 : vector<8x128xf32>
    %c0_72 = arith.constant 0 : index
    %c0_73 = arith.constant 0 : index
    %240 = vector.load %arg6[%c0_72, %c0_73] : memref<8x128xf32, #tpu.memory_space<vmem>>, vector<8x128xf32>
    tpu.vector_store %arg6[%c0_72, %c0_73], %239 {strides = array<i32>} : memref<8x128xf32, #tpu.memory_space<vmem>>, vector<8x128xf32>,
    return
  }
}

</mosaic_0001>

<bundles_post_ra>
// kernel: tpu_custom_call.1
= control target key start
LH: loop header
LB: loop body
LE: loop exit
PB: predicated region body
PF: predicated region fallthrough
CT: control target
= control target key end

     0   :  { %11 = vsyncpa [#allocation4], 0  ;;  %s1424_s0 = inlined_call_operand.vmem [shape: bf16[64,28], index: 0, kind: input, shape index: {}]   ;;  %s1425_s1 = inlined_call_operand.vmem [shape: bf16[28,256], index: 1, kind: input, shape index: {}]   ;;  %s1426_s2 = inlined_call_operand.hbm [shape: bf16[64,256], index: 2, kind: input, shape index: {}]   ;;  %s1427_s3 = inlined_call_operand.vmem [shape: f32[1,256], index: 3, kind: input, shape index: {}]   ;;  %s1428_s4 = inlined_call_operand.hbm [shape: bf16[64,128], index: 4, kind: input, shape index: {}]   ;;  %s1429_s5 = inlined_call_operand.vmem [shape: f32[1,128], index: 5, kind: input, shape index: {}]   ;;  %s1430_s6 = inlined_call_operand.hbm [shape: f32[8,128], index: 6, kind: output, shape index: {}]  }
   0x1   :  { %12 = vsyncpa [#allocation7], 0 }
   0x2   :  { %13 = vsyncpa [#allocation5], 0  ;;  %s1146_s21 = smov [#allocation3]   ;;  %s1074_s25 = scalar_lea.hbm %s1426_s2, 1024 }
   0x3   :  { %s23_s22 = sshll.u32 %s1146_s21, 4  ;;  %p1075_p0 = scmp.ne.s32.totalorder %s1426_s2, %s1074_s25  ;;  %s24_s22 = int_to_ptr.vmem [resolvable:$true] %s23_s22 }
   0x4   :  { %p1078_p1 = scmp.lt.u32.totalorder %s1074_s25, %s1426_s2 }
   0x6   :  { %p1080_p2 = pnand %p1078_p1, %p1075_p0 }
   0x8   :  { %1083 = shalt.err (!%p1080_p2)
}
   0x9   :  { %s1084_s30 = scalar_lea.vmem %s24_s22, 1024  ;;  %p1089_p4 = scmp.lt.s32.totalorder %s24_s22, %s24_s22 }
   0xa   :  { %p1085_p3 = scmp.ne.s32.totalorder %s24_s22, %s1084_s30  ;;  %p1090_p5 = scmp.lt.s32.totalorder %s1084_s30, %s1084_s30 }
   0xc   :  { %p1091_p6 = por %p1090_p5, %p1089_p4 }
   0xe   :  { %p1092_p7 = pnand %p1091_p6, %p1085_p3 }
  0x10   :  { %1095 = shalt.err (!%p1092_p7)
}
  0x11   :  { %s1147_s7 = smov 128   ;;  %s1148_s8 = smov 8  }
  0x12   :  { %29 = dma.hbm_to_vmem [thread:$0]  %s1426_s2, 1024, %s24_s22, [#allocation4], %s1147_s7, %s1147_s7, %s1148_s8  }
  0x13   :  { %s1149_s11 = smov [#allocation6]   ;;  %s1096_s15 = scalar_lea.hbm %s1428_s4, 512 }
  0x14   :  { %s37_s12 = sshll.u32 %s1149_s11, 4  ;;  %p1097_p8 = scmp.ne.s32.totalorder %s1428_s4, %s1096_s15  ;;  %s38_s12 = int_to_ptr.vmem [resolvable:$true] %s37_s12 }
  0x15   :  { %p1100_p9 = scmp.lt.u32.totalorder %s1096_s15, %s1428_s4 }
  0x17   :  { %p1102_p10 = pnand %p1100_p9, %p1097_p8 }
  0x19   :  { %1105 = shalt.err (!%p1102_p10)
}
  0x1a   :  { %s1106_s20 = scalar_lea.vmem %s38_s12, 512  ;;  %p1111_p12 = scmp.lt.s32.totalorder %s38_s12, %s38_s12 }
  0x1b   :  { %p1107_p11 = scmp.ne.s32.totalorder %s38_s12, %s1106_s20  ;;  %p1112_p13 = scmp.lt.s32.totalorder %s1106_s20, %s1106_s20 }
  0x1d   :  { %p1113_p0 = por %p1112_p13, %p1111_p12 }
  0x1f   :  { %p1114_p1 = pnand %p1113_p0, %p1107_p11 }
  0x21   :  { %1117 = shalt.err (!%p1114_p1)
}
  0x22   :  { %s1150_s2 = smov 64   ;;  %s1151_s21 = smov 4  }
  0x23   :  { %43 = dma.hbm_to_vmem [thread:$0]  %s1428_s4, 512, %s38_s12, [#allocation7], %s1150_s2, %s1150_s2, %s1151_s21  }
  0x24   :  { %1140 = dma.done.wait [#allocation4], 1024  }
  0x25   :  { %1141 = vsyncadd [#allocation4], 4294966272 }
  0x26   :  { %1142 = dma.done.wait [#allocation7], 512  }
  0x27   :  { %1143 = vsyncadd [#allocation7], 4294966784  ;;  %v1152_v0 = vmov 0   ;;  %v1219_v1 = vld [vmem:[#allocation3 + $0x4] ss:$8 sps:$4 sm:$0xff]   ;;  %vm128_vm0 = vcmask 1045504   ;;  %v67_v15 = vlaneseq }
  0x28   :  { %167 = vmatprep.mubr.bf16.mxu0 %v1152_v0  ;;  %313 = vmatprep.mubr.bf16.mxu1 %v1152_v0  ;;  %v1221_v2 = vld [vmem:[#allocation3] ss:$8 sps:$4 sm:$0xff]   ;;  %v1003_v3 = vld [vmem:[%s1425_s1 + $0x4] ss:$8 sps:$4 sm:$0xff]   ;;  %v1231_v5 = vld [vmem:[#allocation3 + $0x14] ss:$8 sps:$4 sm:$0xff]  }
  0x29   :  { %281 = vmatprep.subr.bf16.mxu1 %v1219_v1  ;;  %v1005_v4 = vld [vmem:[%s1425_s1] ss:$8 sps:$4 sm:$0xff]   ;;  %v1233_v6 = vld [vmem:[#allocation3 + $0x10] ss:$8 sps:$4 sm:$0xff]   ;;  %135 = vmatprep.subr.bf16.mxu0 %v1003_v3  ;;  %v1242_v9 = vld [vmem:[#allocation3 + $0x24] ss:$8 sps:$4 sm:$0xff]  }
  0x2a   :  { %282 = vmatpush1.bf16.msra.mxu1 %v1221_v2  ;;  %v1009_v7 = vld [vmem:[%s1425_s1 + $0x14] ss:$8 sps:$4 sm:$0x3f]   ;;  %136 = vmatpush1.bf16.msra.mxu0 %v1005_v4  ;;  %v1011_v8 = vld [vmem:[%s1425_s1 + $0x10] ss:$8 sps:$4 sm:$0x3f]  }
  0x2b   :  { %283 = vmatprep.subr.bf16.mxu1 %v1231_v5  ;;  %947 = vmatprep.subr.msk.bf16.mxu0 %vm128_vm0, %v1009_v7  ;;  %v130_v10 = vsel %vm128_vm0, %v1011_v8, 0  ;;  %v1245_v11 = vld [vmem:[#allocation3 + $0x20] ss:$8 sps:$4 sm:$0xff]   ;;  %vm115_vm1 = vcmask 228352   ;;  %v1251_v13 = vld [vmem:[#allocation3 + $0x34] ss:$8 sps:$4 sm:$0xff]  }
  0x2c   :  { %v1015_v12 = vld [vmem:[%s1424_s0] sm:$0xff]   ;;  %v1253_v14 = vld [vmem:[#allocation3 + $0x30] ss:$8 sps:$4 sm:$0xff]   ;;  %v68_v16 = vshrl.u32 %v67_v15, 7  ;;  %vm277_vm2 = vcmask 523264   ;;  %v1019_v61 = vld [vmem:[%s1424_s0 + $0x8] sm:$0xff]  }
  0x2d   :  { %v65_v18 = vld [vmem:[%s1427_s3] sm:$0x3]  ;;  %v1020_v62 = vld [vmem:[%s1424_s0 + $0x10] sm:$0xff]   ;;  %v1021_v63 = vld [vmem:[%s1424_s0 + $0x18] sm:$0xff]   ;;  %vm1154_vm3 = vmmov 0   ;;  %s1155_s16 = smov [#allocation8]  }
  0x2e   :  { %284 = vmatpush1.bf16.msra.mxu1 %v1233_v6  ;;  %138 = vmatpush1.bf16.msra.mxu0 %v130_v10  ;;  %v69_v17 = vsub.s32 0, %v68_v16  ;;  %v73_v19 = vsub.s32 1, %v68_v16  ;;  %s922_s17 = sshll.u32 %s1155_s16, 4  ;;  %s923_s17 = int_to_ptr.vmem [resolvable:$true] %s922_s17 }
  0x2f   :  { %285 = vmatprep.subr.bf16.mxu1 %v1242_v9  ;;  %421 = vmatprep.subr.bf16.mxu0 %v1219_v1  ;;  %s1118_s18 = scalar_lea.vmem %s923_s17, 128  ;;  %p1123_p3 = scmp.lt.s32.totalorder %s923_s17, %s923_s17 }
  0x30   :  { %v1283_v20 = vrot.slane %v65_v18, %v69_v17  ;;  %v1285_v22 = vrot.slane %v65_v18, %v73_v19  ;;  %p1119_p2 = scmp.ne.s32.totalorder %s923_s17, %s1118_s18  ;;  %p1124_p4 = scmp.lt.s32.totalorder %s1118_s18, %s1118_s18 }
  0x31   :  { %948 = vmatmul.mubr.msk.bf16.vlgmr.msra.gmra.mrb[0].mxu0 %vm115_vm1, %v1015_v12 }
  0x32   :  { %286 = vmatpush1.bf16.msra.mxu1 %v1245_v11  ;;  %422 = vmatpush1.bf16.msra.mxu0 %v1221_v2  ;;  %p1125_p5 = por %p1124_p4, %p1123_p3 }
  0x33   :  { %287 = vmatprep.subr.bf16.mxu1 %v1251_v13  ;;  %177 = vmatprep.mubr.bf16.mxu0 %v1152_v0 }
  0x34   :  { %423 = vmatprep.subr.bf16.mxu0 %v1231_v5  ;;  %p1126_p6 = pnand %p1125_p5, %p1119_p2 }
  0x36   :  { %288 = vmatpush1.bf16.msra.mxu1 %v1253_v14  ;;  %424 = vmatpush1.bf16.msra.mxu0 %v1233_v6 }
  0x37   :  { %351 = vmatprep.subr.bf16.mxu1 %v1219_v1  ;;  %425 = vmatprep.subr.bf16.mxu0 %v1242_v9 }
  0x39   :  { %314 = vmatmul.mubr.bf16.vlgmr.msra.gmra.mrb[0].mxu1 %v1152_v0  ;;  %949 = vmatmul.mubr.msk.bf16.gmra.mrb[4].mxu0 %vm115_vm1, %v1019_v61 }
  0x3a   :  { %352 = vmatpush1.bf16.msra.mxu1 %v1221_v2  ;;  %383 = vmatprep.mubr.bf16.mxu1 %v1152_v0 }
  0x3b   :  { %353 = vmatprep.subr.bf16.mxu1 %v1231_v5  ;;  %426 = vmatpush1.bf16.msra.mxu0 %v1245_v11 }
  0x3c   :  { %427 = vmatprep.subr.bf16.mxu0 %v1251_v13  ;;  %187 = vmatprep.mubr.bf16.mxu0 %v1152_v0 }
  0x3e   :  { %354 = vmatpush1.bf16.msra.mxu1 %v1233_v6 }
  0x3f   :  { %355 = vmatprep.subr.bf16.mxu1 %v1242_v9  ;;  %428 = vmatpush1.bf16.msra.mxu0 %v1253_v14 }
  0x40   :  { %561 = vmatprep.subr.bf16.mxu0 %v1219_v1 }
  0x41   :  { %950 = vmatmul.mubr.msk.bf16.gmra.mrb[8].mxu0 %vm115_vm1, %v1020_v62 }
  0x42   :  { %356 = vmatpush1.bf16.msra.mxu1 %v1245_v11  ;;  %197 = vmatprep.mubr.bf16.mxu0 %v1152_v0 }
  0x43   :  { %357 = vmatprep.subr.bf16.mxu1 %v1251_v13 }
  0x46   :  { %358 = vmatpush1.bf16.msra.mxu1 %v1253_v14 }
  0x47   :  { %491 = vmatprep.subr.bf16.mxu1 %v1219_v1 }
  0x49   :  { %951 = vmatmul.mubr.msk.bf16.gmra.mrb[12].mxu0 %vm115_vm1, %v1021_v63 }
  0x4a   :  { %453 = vmatprep.mubr.bf16.mxu0 %v1152_v0 }
 0x104   :  { %v169_v21 = vpop.f32.mrb[0].mxu0 }
 0x105   :  { %v171_v23 = vpop.f32.mrb[1].mxu0  ;;  %v170_v25 = vadd.f32 %v169_v21, %v1283_v20 }
 0x106   :  { %v173_v24 = vpop.f32.mrb[2].mxu0  ;;  %v172_v27 = vadd.f32 %v171_v23, %v1285_v22 }
 0x107   :  { %v175_v26 = vpop.f32.mrb[3].mxu0  ;;  %v174_v48 = vadd.f32 %v173_v24, %v1283_v20 }
 0x108   :  { %v176_v49 = vadd.f32 %v175_v26, %v1285_v22 }
 0x10c   :  { %v315_v28 = vpop.f32.mrb[0].mxu1  ;;  %v179_v17 = vpop.f32.mrb[4].mxu0 }
 0x10d   :  { %v322_v29 = vadd.f32 %v315_v28, %v170_v25  ;;  %v317_v30 = vpop.f32.mrb[1].mxu1  ;;  %v181_v18 = vpop.f32.mrb[5].mxu0 }
 0x10e   :  { %v323_v31 = vadd.f32 %v317_v30, %v172_v27  ;;  %v319_v32 = vpop.f32.mrb[2].mxu1  ;;  %v183_v19 = vpop.f32.mrb[6].mxu0 }
 0x10f   :  { %1026 = vtanh.f32 %v322_v29  ;;  %v320_v33 = vpop.f32.mrb[3].mxu1  ;;  %v185_v21 = vpop.f32.mrb[7].mxu0  ;;  %v180_v32 = vadd.f32 %v179_v17, %v1283_v20 }
 0x110   :  { %1028 = vtanh.f32 %v323_v31  ;;  %v182_v33 = vadd.f32 %v181_v18, %v1285_v22 }
 0x114   :  { %v1320_v23 = vpop.f32.mrb[8].mxu0 }
 0x115   :  { %v1322_v24 = vpop.f32.mrb[9].mxu0 }
 0x116   :  { %v1324_v25 = vpop.f32.mrb[10].mxu0 }
 0x117   :  { %v1326_v26 = vpop.f32.mrb[11].mxu0 }
 0x119   :  { %v1027_v34 = vpop.eup %1026 }
 0x11a   :  { %v326_v35 = vmul.f32 0.5, %v1027_v34  ;;  %v1029_v37 = vpop.eup %1028 }
 0x11b   :  { %v328_v42 = vmul.f32 0.5, %v1029_v37 }
 0x11c   :  { %v327_v36 = vadd.f32 0.5, %v326_v35  ;;  %v1328_v27 = vpop.f32.mrb[12].mxu0 }
 0x11d   :  { %v329_v43 = vadd.f32 0.5, %v328_v42  ;;  %v1330_v28 = vpop.f32.mrb[13].mxu0 }
 0x11e   :  { %v331_v38 = vmul.f32 %v1029_v37, %v327_v36  ;;  %v330_v39 = vmul.f32 0.0, %v327_v36  ;;  %v1332_v29 = vpop.f32.mrb[14].mxu0 }
 0x11f   :  { %v1334_v30 = vpop.f32.mrb[15].mxu0 }
 0x120   :  { %333 = vrot.lane.b32.xlu0 %v331_v38, %s1150_s2 }
 0x192   :  { %v334_v40 = vpop.permute.xlu0 %333 }
 0x193   :  { %v336_v41 = vadd.f32 %v334_v40, %v330_v39 }
 0x195   :  { %1030 = vtanh.f32 %v336_v41 }
 0x19f   :  { %v1031_v44 = vpop.eup %1030 }
 0x1a0   :  { %v338_v45 = vmul.f32 %v1031_v44, %v329_v43 }
 0x1a2   :  { %v344_v46 = vpack.c.bf16 %v338_v45, %v338_v45 }
 0x1a4   :  { %346 = vrot.lane.b32.xlu0 %v344_v46, %s1150_s2 }
 0x216   :  { %v347_v47 = vpop.permute.xlu0 %346 }
 0x217   :  { %960 = vmatmul.mubr.msk.bf16.vlgmr.msra.gmra.mrb[4].mxu1 %vm277_vm2, %v347_v47 }
 0x218   :  { %492 = vmatpush1.bf16.msra.mxu1 %v1221_v2  ;;  %523 = vmatprep.mubr.bf16.mxu1 %v1152_v0 }
 0x219   :  { %493 = vmatprep.subr.bf16.mxu1 %v1231_v5 }
 0x21c   :  { %494 = vmatpush1.bf16.msra.mxu1 %v1233_v6 }
 0x21d   :  { %495 = vmatprep.subr.bf16.mxu1 %v1242_v9 }
 0x220   :  { %496 = vmatpush1.bf16.msra.mxu1 %v1245_v11 }
 0x221   :  { %497 = vmatprep.subr.bf16.mxu1 %v1251_v13 }
 0x224   :  { %498 = vmatpush1.bf16.msra.mxu1 %v1253_v14 }
 0x225   :  { %631 = vmatprep.subr.bf16.mxu1 %v1219_v1 }
 0x2ea   :  { %v385_v50 = vpop.f32.mrb[4].mxu1 }
 0x2eb   :  { %v392_v51 = vadd.f32 %v385_v50, %v174_v48  ;;  %v387_v52 = vpop.f32.mrb[5].mxu1 }
 0x2ec   :  { %v393_v53 = vadd.f32 %v387_v52, %v176_v49  ;;  %v389_v54 = vpop.f32.mrb[6].mxu1 }
 0x2ed   :  { %1032 = vtanh.f32 %v392_v51  ;;  %v390_v55 = vpop.f32.mrb[7].mxu1  ;;  %v184_v54 = vadd.f32 %v183_v19, %v1283_v20 }
 0x2ee   :  { %1034 = vtanh.f32 %v393_v53  ;;  %v186_v55 = vadd.f32 %v185_v21, %v1285_v22  ;;  %v190_v21 = vadd.f32 %v1320_v23, %v1283_v20 }
 0x2f7   :  { %v1033_v56 = vpop.eup %1032 }
 0x2f8   :  { %v396_v57 = vmul.f32 0.5, %v1033_v56  ;;  %v1035_v59 = vpop.eup %1034 }
 0x2f9   :  { %v398_v8 = vmul.f32 0.5, %v1035_v59 }
 0x2fa   :  { %v397_v58 = vadd.f32 0.5, %v396_v57 }
 0x2fb   :  { %v399_v10 = vadd.f32 0.5, %v398_v8 }
 0x2fc   :  { %v401_v60 = vmul.f32 %v1035_v59, %v397_v58  ;;  %v400_v3 = vmul.f32 %v397_v58, %v336_v41 }
 0x2fe   :  { %403 = vrot.lane.b32.xlu1 %v401_v60, %s1150_s2 }
 0x370   :  { %v404_v4 = vpop.permute.xlu1 %403 }
 0x371   :  { %v406_v7 = vadd.f32 %v404_v4, %v400_v3 }
 0x373   :  { %1036 = vtanh.f32 %v406_v7 }
 0x37d   :  { %v1037_v12 = vpop.eup %1036 }
 0x37e   :  { %v408_v15 = vmul.f32 %v1037_v12, %v399_v10 }
 0x380   :  { %v414_v16 = vpack.c.bf16 %v408_v15, %v408_v15 }
 0x382   :  { %416 = vrot.lane.b32.xlu1 %v414_v16, %s1150_s2 }
 0x3f4   :  { %v417_v31 = vpop.permute.xlu1 %416 }
 0x3f5   :  { %961 = vmatmul.mubr.msk.bf16.vlgmr.msra.gmra.mrb[16].mxu0 %vm277_vm2, %v417_v31  ;;  %v192_v31 = vadd.f32 %v1322_v24, %v1285_v22 }
 0x3f6   :  { %562 = vmatpush1.bf16.msra.mxu0 %v1221_v2  ;;  %593 = vmatprep.mubr.bf16.mxu0 %v1152_v0 }
 0x3f7   :  { %563 = vmatprep.subr.bf16.mxu0 %v1231_v5 }
 0x3fa   :  { %564 = vmatpush1.bf16.msra.mxu0 %v1233_v6 }
 0x3fb   :  { %565 = vmatprep.subr.bf16.mxu0 %v1242_v9 }
 0x3fe   :  { %566 = vmatpush1.bf16.msra.mxu0 %v1245_v11 }
 0x3ff   :  { %567 = vmatprep.subr.bf16.mxu0 %v1251_v13 }
 0x402   :  { %568 = vmatpush1.bf16.msra.mxu0 %v1253_v14 }
 0x403   :  { %701 = vmatprep.subr.bf16.mxu0 %v1219_v1 }
 0x4c8   :  { %v455_v34 = vpop.f32.mrb[16].mxu0 }
 0x4c9   :  { %v462_v35 = vadd.f32 %v455_v34, %v180_v32  ;;  %v457_v36 = vpop.f32.mrb[17].mxu0 }
 0x4ca   :  { %v463_v37 = vadd.f32 %v457_v36, %v182_v33  ;;  %v459_v38 = vpop.f32.mrb[18].mxu0 }
 0x4cb   :  { %1038 = vtanh.f32 %v462_v35  ;;  %v460_v39 = vpop.f32.mrb[19].mxu0 }
 0x4cc   :  { %1040 = vtanh.f32 %v463_v37 }
 0x4d5   :  { %v1039_v40 = vpop.eup %1038 }
 0x4d6   :  { %v466_v41 = vmul.f32 0.5, %v1039_v40  ;;  %v1041_v43 = vpop.eup %1040 }
 0x4d7   :  { %v468_v48 = vmul.f32 0.5, %v1041_v43 }
 0x4d8   :  { %v467_v42 = vadd.f32 0.5, %v466_v41 }
 0x4d9   :  { %v469_v49 = vadd.f32 0.5, %v468_v48 }
 0x4da   :  { %v471_v44 = vmul.f32 %v1041_v43, %v467_v42  ;;  %v470_v45 = vmul.f32 %v467_v42, %v406_v7 }
 0x4dc   :  { %473 = vrot.lane.b32.xlu0 %v471_v44, %s1150_s2 }
 0x54e   :  { %v474_v46 = vpop.permute.xlu0 %473 }
 0x54f   :  { %v476_v47 = vadd.f32 %v474_v46, %v470_v45 }
 0x551   :  { %1042 = vtanh.f32 %v476_v47 }
 0x55b   :  { %v1043_v50 = vpop.eup %1042 }
 0x55c   :  { %v478_v51 = vmul.f32 %v1043_v50, %v469_v49  ;;  %v194_v50 = vadd.f32 %v1324_v25, %v1283_v20 }
 0x55e   :  { %v484_v52 = vpack.c.bf16 %v478_v51, %v478_v51 }
 0x560   :  { %486 = vrot.lane.b32.xlu1 %v484_v52, %s1150_s2 }
 0x5d2   :  { %v487_v53 = vpop.permute.xlu1 %486 }
 0x5d3   :  { %962 = vmatmul.mubr.msk.bf16.vlgmr.msra.gmra.mrb[8].mxu1 %vm277_vm2, %v487_v53 }
 0x5d4   :  { %632 = vmatpush1.bf16.msra.mxu1 %v1221_v2  ;;  %663 = vmatprep.mubr.bf16.mxu1 %v1152_v0 }
 0x5d5   :  { %633 = vmatprep.subr.bf16.mxu1 %v1231_v5 }
 0x5d8   :  { %634 = vmatpush1.bf16.msra.mxu1 %v1233_v6 }
 0x5d9   :  { %635 = vmatprep.subr.bf16.mxu1 %v1242_v9 }
 0x5dc   :  { %636 = vmatpush1.bf16.msra.mxu1 %v1245_v11 }
 0x5dd   :  { %637 = vmatprep.subr.bf16.mxu1 %v1251_v13 }
 0x5e0   :  { %638 = vmatpush1.bf16.msra.mxu1 %v1253_v14 }
 0x5e1   :  { %771 = vmatprep.subr.bf16.mxu1 %v1219_v1 }
 0x6a6   :  { %v525_v56 = vpop.f32.mrb[8].mxu1 }
 0x6a7   :  { %v532_v57 = vadd.f32 %v525_v56, %v184_v54  ;;  %v527_v58 = vpop.f32.mrb[9].mxu1 }
 0x6a8   :  { %v533_v59 = vadd.f32 %v527_v58, %v186_v55  ;;  %v529_v60 = vpop.f32.mrb[10].mxu1 }
 0x6a9   :  { %1044 = vtanh.f32 %v532_v57  ;;  %v530_v61 = vpop.f32.mrb[11].mxu1 }
 0x6aa   :  { %1046 = vtanh.f32 %v533_v59 }
 0x6b3   :  { %v1045_v62 = vpop.eup %1044 }
 0x6b4   :  { %v536_v63 = vmul.f32 0.5, %v1045_v62  ;;  %v1047_v4 = vpop.eup %1046  ;;  %v200_v62 = vadd.f32 %v1328_v27, %v1283_v20 }
 0x6b5   :  { %v538_v12 = vmul.f32 0.5, %v1047_v4 }
 0x6b6   :  { %v537_v3 = vadd.f32 0.5, %v536_v63  ;;  %v202_v63 = vadd.f32 %v1330_v28, %v1285_v22 }
 0x6b7   :  { %v539_v15 = vadd.f32 0.5, %v538_v12 }
 0x6b8   :  { %v541_v7 = vmul.f32 %v1047_v4, %v537_v3  ;;  %v540_v1 = vmul.f32 %v537_v3, %v476_v47 }
 0x6ba   :  { %543 = vrot.lane.b32.xlu0 %v541_v7, %s1150_s2 }
 0x72c   :  { %v544_v8 = vpop.permute.xlu0 %543 }
 0x72d   :  { %v546_v10 = vadd.f32 %v544_v8, %v540_v1 }
 0x72f   :  { %1048 = vtanh.f32 %v546_v10 }
 0x739   :  { %v1049_v16 = vpop.eup %1048 }
 0x73a   :  { %v548_v17 = vmul.f32 %v1049_v16, %v539_v15 }
 0x73c   :  { %v554_v18 = vpack.c.bf16 %v548_v17, %v548_v17 }
 0x73e   :  { %556 = vrot.lane.b32.xlu1 %v554_v18, %s1150_s2 }
 0x7b0   :  { %v557_v19 = vpop.permute.xlu1 %556 }
 0x7b1   :  { %963 = vmatmul.mubr.msk.bf16.vlgmr.msra.gmra.mrb[20].mxu0 %vm277_vm2, %v557_v19 }
 0x7b2   :  { %702 = vmatpush1.bf16.msra.mxu0 %v1221_v2  ;;  %733 = vmatprep.mubr.bf16.mxu0 %v1152_v0 }
 0x7b3   :  { %703 = vmatprep.subr.bf16.mxu0 %v1231_v5 }
 0x7b6   :  { %704 = vmatpush1.bf16.msra.mxu0 %v1233_v6 }
 0x7b7   :  { %705 = vmatprep.subr.bf16.mxu0 %v1242_v9 }
 0x7ba   :  { %706 = vmatpush1.bf16.msra.mxu0 %v1245_v11 }
 0x7bb   :  { %707 = vmatprep.subr.bf16.mxu0 %v1251_v13 }
 0x7be   :  { %708 = vmatpush1.bf16.msra.mxu0 %v1253_v14 }
 0x884   :  { %v595_v32 = vpop.f32.mrb[20].mxu0 }
 0x885   :  { %v602_v33 = vadd.f32 %v595_v32, %v190_v21  ;;  %v597_v34 = vpop.f32.mrb[21].mxu0 }
 0x886   :  { %v603_v35 = vadd.f32 %v597_v34, %v192_v31  ;;  %v599_v36 = vpop.f32.mrb[22].mxu0 }
 0x887   :  { %1050 = vtanh.f32 %v602_v33  ;;  %v600_v37 = vpop.f32.mrb[23].mxu0  ;;  %v204_v36 = vadd.f32 %v1332_v29, %v1283_v20  ;;  %v1153_v20 = vmov 0.0   ;;  %v1024_v29 = vld [vmem:[#allocation6 + $0x10] sm:$0xff]  }
 0x888   :  { %1052 = vtanh.f32 %v603_v35  ;;  %v206_v37 = vadd.f32 %v1334_v30, %v1285_v22  ;;  %978 = vmatprep.subr.bf16.mxu0 %v1153_v20  ;;  %v1025_v30 = vld [vmem:[#allocation6 + $0x18] sm:$0xff]  }
 0x891   :  { %v1051_v38 = vpop.eup %1050 }
 0x892   :  { %v606_v39 = vmul.f32 0.5, %v1051_v38  ;;  %v1053_v41 = vpop.eup %1052 }
 0x893   :  { %v608_v24 = vmul.f32 0.5, %v1053_v41 }
 0x894   :  { %v607_v40 = vadd.f32 0.5, %v606_v39 }
 0x895   :  { %v609_v45 = vadd.f32 0.5, %v608_v24 }
 0x896   :  { %v611_v42 = vmul.f32 %v1053_v41, %v607_v40  ;;  %v610_v43 = vmul.f32 %v607_v40, %v546_v10 }
 0x898   :  { %613 = vrot.lane.b32.xlu0 %v611_v42, %s1150_s2 }
 0x90a   :  { %v614_v23 = vpop.permute.xlu0 %613 }
 0x90b   :  { %v616_v44 = vadd.f32 %v614_v23, %v610_v43 }
 0x90d   :  { %1054 = vtanh.f32 %v616_v44 }
 0x917   :  { %v1055_v46 = vpop.eup %1054 }
 0x918   :  { %v618_v47 = vmul.f32 %v1055_v46, %v609_v45 }
 0x91a   :  { %v624_v48 = vpack.c.bf16 %v618_v47, %v618_v47  ;;  %v1022_v47 = vld [vmem:[#allocation6] sm:$0xff]  }
 0x91c   :  { %626 = vrot.lane.b32.xlu1 %v624_v48, %s1150_s2 }
 0x98e   :  { %v627_v49 = vpop.permute.xlu1 %626 }
 0x98f   :  { %964 = vmatmul.mubr.msk.bf16.vlgmr.msra.gmra.mrb[12].mxu1 %vm277_vm2, %v627_v49 }
 0x990   :  { %772 = vmatpush1.bf16.msra.mxu1 %v1221_v2  ;;  %803 = vmatprep.mubr.bf16.mxu1 %v1152_v0  ;;  %v196_v2 = vadd.f32 %v1326_v26, %v1285_v22  ;;  %v1023_v22 = vld [vmem:[#allocation6 + $0x8] sm:$0xff]  }
 0x991   :  { %773 = vmatprep.subr.bf16.mxu1 %v1231_v5 }
 0x994   :  { %774 = vmatpush1.bf16.msra.mxu1 %v1233_v6 }
 0x995   :  { %775 = vmatprep.subr.bf16.mxu1 %v1242_v9 }
 0x998   :  { %776 = vmatpush1.bf16.msra.mxu1 %v1245_v11 }
 0x999   :  { %777 = vmatprep.subr.bf16.mxu1 %v1251_v13 }
 0x99c   :  { %778 = vmatpush1.bf16.msra.mxu1 %v1253_v14 }
 0xa62   :  { %v665_v51 = vpop.f32.mrb[12].mxu1 }
 0xa63   :  { %v672_v0 = vadd.f32 %v665_v51, %v194_v50  ;;  %v667_v52 = vpop.f32.mrb[13].mxu1 }
 0xa64   :  { %v673_v5 = vadd.f32 %v667_v52, %v196_v2  ;;  %v669_v53 = vpop.f32.mrb[14].mxu1 }
 0xa65   :  { %1056 = vtanh.f32 %v672_v0  ;;  %v670_v6 = vpop.f32.mrb[15].mxu1 }
 0xa66   :  { %1058 = vtanh.f32 %v673_v5  ;;  %v967_v6 = vld [vmem:[%s1429_s5] ss:$0 sm:$0xff] }
 0xa6f   :  { %v1057_v9 = vpop.eup %1056 }
 0xa70   :  { %v676_v11 = vmul.f32 0.5, %v1057_v9  ;;  %v1059_v13 = vpop.eup %1058 }
 0xa71   :  { %v678_v26 = vmul.f32 0.5, %v1059_v13 }
 0xa72   :  { %v677_v54 = vadd.f32 0.5, %v676_v11 }
 0xa73   :  { %v679_v57 = vadd.f32 0.5, %v678_v26 }
 0xa74   :  { %v681_v55 = vmul.f32 %v1059_v13, %v677_v54  ;;  %v680_v14 = vmul.f32 %v677_v54, %v616_v44 }
 0xa76   :  { %683 = vrot.lane.b32.xlu0 %v681_v55, %s1150_s2 }
 0xae8   :  { %v684_v25 = vpop.permute.xlu0 %683 }
 0xae9   :  { %v686_v56 = vadd.f32 %v684_v25, %v680_v14 }
 0xaeb   :  { %1060 = vtanh.f32 %v686_v56 }
 0xaf5   :  { %v1061_v58 = vpop.eup %1060 }
 0xaf6   :  { %v688_v59 = vmul.f32 %v1061_v58, %v679_v57 }
 0xaf8   :  { %v694_v60 = vpack.c.bf16 %v688_v59, %v688_v59 }
 0xafa   :  { %696 = vrot.lane.b32.xlu1 %v694_v60, %s1150_s2 }
 0xb6c   :  { %v697_v61 = vpop.permute.xlu1 %696 }
 0xb6d   :  { %965 = vmatmul.mubr.msk.bf16.vlgmr.msra.gmra.mrb[24].mxu0 %vm277_vm2, %v697_v61 }
 0xb6e   :  { %986 = vmatprep.mubr.msk.bf16.mxu0 %vm1154_vm3, %v1153_v20  ;;  %979 = vmatpush3.bf16.msra.mxu0 %v1022_v47 }
 0xb6f   :  { %980 = vmatprep.subr.bf16.mxu0 %v1153_v20 }
 0xb72   :  { %981 = vmatpush3.bf16.msra.mxu0 %v1023_v22 }
 0xb73   :  { %982 = vmatprep.subr.bf16.mxu0 %v1153_v20 }
 0xb76   :  { %983 = vmatpush3.bf16.msra.mxu0 %v1024_v29 }
 0xb77   :  { %984 = vmatprep.subr.bf16.mxu0 %v1153_v20 }
 0xb7a   :  { %985 = vmatpush3.bf16.msra.mxu0 %v1025_v30 }
 0xc40   :  { %v735_v3 = vpop.f32.mrb[24].mxu0 }
 0xc41   :  { %v742_v4 = vadd.f32 %v735_v3, %v200_v62  ;;  %v737_v7 = vpop.f32.mrb[25].mxu0 }
 0xc42   :  { %v743_v1 = vadd.f32 %v737_v7, %v202_v63  ;;  %v739_v8 = vpop.f32.mrb[26].mxu0 }
 0xc43   :  { %1062 = vtanh.f32 %v742_v4  ;;  %v740_v10 = vpop.f32.mrb[27].mxu0 }
 0xc44   :  { %1064 = vtanh.f32 %v743_v1 }
 0xc4d   :  { %v1063_v12 = vpop.eup %1062 }
 0xc4e   :  { %v746_v15 = vmul.f32 0.5, %v1063_v12  ;;  %v1065_v17 = vpop.eup %1064 }
 0xc4f   :  { %v748_v28 = vmul.f32 0.5, %v1065_v17 }
 0xc50   :  { %v747_v16 = vadd.f32 0.5, %v746_v15 }
 0xc51   :  { %v749_v31 = vadd.f32 0.5, %v748_v28 }
 0xc52   :  { %v751_v18 = vmul.f32 %v1065_v17, %v747_v16  ;;  %v750_v19 = vmul.f32 %v747_v16, %v686_v56 }
 0xc54   :  { %753 = vrot.lane.b32.xlu0 %v751_v18, %s1150_s2 }
 0xcc6   :  { %v754_v27 = vpop.permute.xlu0 %753 }
 0xcc7   :  { %v756_v21 = vadd.f32 %v754_v27, %v750_v19 }
 0xcc9   :  { %1066 = vtanh.f32 %v756_v21 }
 0xcd3   :  { %v1067_v32 = vpop.eup %1066 }
 0xcd4   :  { %v758_v33 = vmul.f32 %v1067_v32, %v749_v31 }
 0xcd6   :  { %v764_v34 = vpack.c.bf16 %v758_v33, %v758_v33 }
 0xcd8   :  { %766 = vrot.lane.b32.xlu1 %v764_v34, %s1150_s2 }
 0xd4a   :  { %v767_v35 = vpop.permute.xlu1 %766 }
 0xd4b   :  { %966 = vmatmul.mubr.msk.bf16.vlgmr.msra.gmra.mrb[16].mxu1 %vm277_vm2, %v767_v35 }
 0xe1e   :  { %v805_v38 = vpop.f32.mrb[16].mxu1 }
 0xe1f   :  { %v812_v39 = vadd.f32 %v805_v38, %v204_v36  ;;  %v807_v40 = vpop.f32.mrb[17].mxu1 }
 0xe20   :  { %v813_v41 = vadd.f32 %v807_v40, %v206_v37  ;;  %v809_v42 = vpop.f32.mrb[18].mxu1 }
 0xe21   :  { %1068 = vtanh.f32 %v812_v39  ;;  %v810_v43 = vpop.f32.mrb[19].mxu1 }
 0xe22   :  { %1070 = vtanh.f32 %v813_v41 }
 0xe2b   :  { %v1069_v23 = vpop.eup %1068 }
 0xe2c   :  { %v816_v44 = vmul.f32 0.5, %v1069_v23  ;;  %v1071_v45 = vpop.eup %1070 }
 0xe2d   :  { %v818_v2 = vmul.f32 0.5, %v1071_v45 }
 0xe2e   :  { %v817_v24 = vadd.f32 0.5, %v816_v44 }
 0xe2f   :  { %v819_v51 = vadd.f32 0.5, %v818_v2 }
 0xe30   :  { %v821_v46 = vmul.f32 %v1071_v45, %v817_v24  ;;  %v820_v48 = vmul.f32 %v817_v24, %v756_v21 }
 0xe32   :  { %823 = vrot.lane.b32.xlu0 %v821_v46, %s1150_s2 }
 0xea4   :  { %v824_v49 = vpop.permute.xlu0 %823 }
 0xea5   :  { %v826_v50 = vadd.f32 %v824_v49, %v820_v48 }
 0xea7   :  { %1072 = vtanh.f32 %v826_v50 }
 0xeb1   :  { %v1073_v0 = vpop.eup %1072 }
 0xeb2   :  { %v828_v52 = vmul.f32 %v1073_v0, %v819_v51 }
 0xeb4   :  { %v829_v5 = vpack.c.bf16 %v828_v52, %v828_v52 }
 0xeb6   :  { %846 = vrot.lane.b32.xlu1 %v829_v5, %s1150_s2 }
 0xf28   :  { %v847_v53 = vpop.permute.xlu1 %846 }
 0xf29   :  { %987 = vmatmul.mubr.msk.bf16.vlgmr.msra.gmra.mrb[28].mxu0 %vm277_vm2, %v847_v53 }
 0xffc   :  { %v909_v9 = vpop.f32.mrb[28].mxu0 }
 0xffd   :  { %v910_v11 = vadd.f32 %v967_v6, %v909_v9  ;;  %v988_v54 = vpop.f32.mrb[29].mxu0 }
 0xffe   :  { %v912_v13 = vpop.f32.mrb[30].mxu0 }
 0xfff   :  { %915 = vst [vmem:[#allocation8] sm:$0xff] %v910_v11  ;;  %v989_v55 = vpop.f32.mrb[31].mxu0 }
0x1000   :  { %1129 = shalt.err (!%p1126_p6)
}
0x1001   :  { %s1130_s5 = scalar_lea.hbm %s1430_s6, 128 }
0x1002   :  { %p1131_p7 = scmp.ne.s32.totalorder %s1430_s6, %s1130_s5  ;;  %p1134_p8 = scmp.lt.u32.totalorder %s1130_s5, %s1430_s6 }
0x1004   :  { %p1136_p9 = pnand %p1134_p8, %p1131_p7 }
0x1006   :  { %1139 = shalt.err (!%p1136_p9)
}
0x1007   :  { %925 = dma.vmem_to_hbm [thread:$0]  %s923_s17, 128, %s1430_s6, [#allocation5]  }
0x1008   :  { %1144 = dma.done.wait [#allocation5], 128  }
0x1009   :  { %1145 = vsyncadd [#allocation5], 4294967168 }
0x100a   :  { %929 = vsyncpa [#allocation4], 1 }
0x100b   :  { %930 = vsyncpa [#allocation7], 1 }
0x100c   :  { %931 = vsyncpa [#allocation5], 1 }

</bundles_post_ra>
